<compile_context>
chip_gen: v5e
topology: v5e:2x2
jax: 0.10.0
libtpu: 0.0.40
codegen_flags: <defaults>
</compile_context>

<pallas_src>
import math

import jax
import jax.numpy as jnp
from jax.experimental import pallas as pl
from jax.experimental.pallas import tpu as pltpu


def necto_kernel(q_ref, kv_ref, mbias_ref,
                 wq_ref, bq_ref, wk_ref, bk_ref, wv_ref, bv_ref,
                 wo_ref, bo_ref,
                 out_ref):
    """One batch *tile* per grid step; everything resident in VMEM."""
    bt = mbias_ref.shape[0]              # batch-tile size (static)
    nq = q_ref.shape[0] // bt
    nkv = kv_ref.shape[0] // bt
    d = wq_ref.shape[1]

    bf16 = jnp.bfloat16
    qf = q_ref[...].astype(bf16)
    kvf = kv_ref[...].astype(bf16)

    # --- earl: batch-folded linear projections (tall MXU matmuls, f32 acc) ---
    # wq already carries the 1/sqrt(d) attention scale (folded in the wrapper).
    Q = jnp.dot(qf, wq_ref[...], preferred_element_type=jnp.float32) + bq_ref[...]
    K = jnp.dot(kvf, wk_ref[...], preferred_element_type=jnp.float32) + bk_ref[...]
    V = jnp.dot(kvf, wv_ref[...], preferred_element_type=jnp.float32) + bv_ref[...]

    Qb = Q.reshape(bt, nq, d).astype(bf16)
    Kb = K.reshape(bt, nkv, d).astype(bf16)
    Vb = V.reshape(bt, nkv, d).astype(bf16)

    # --- earl: masked cross-attention (contract last axes, no K.T) ---
    scores = jnp.einsum("bqd,bkd->bqk", Qb, Kb,
                        preferred_element_type=jnp.float32)
    scores = scores + mbias_ref[...]                          # (bt,1,nkv) bcast

    s_max = jnp.max(scores, axis=-1, keepdims=True)
    p = jnp.exp(scores - s_max)                               # f32 softmax math
    p = p * pl.reciprocal(jnp.sum(p, axis=-1, keepdims=True), approx=True)

    attn = jnp.einsum("bqk,bkd->bqd", p.astype(bf16), Vb,
                      preferred_element_type=jnp.float32)

    # --- relu (f32, VPU) ---
    h = jnp.maximum(attn, 0.0).reshape(bt * nq, d)

    # --- output head: batch-folded matmul ---
    out = jnp.dot(h.astype(bf16), wo_ref[...],
                  preferred_element_type=jnp.float32) + bo_ref[...]
    # TODO(synk): for DOUT << 128 a lane-flattened (bt, nq*DOUT) output slab
    # would make this store fully lane-dense; kept row-major here to avoid an
    # in-kernel sublane->lane relayout (XLU transpose) per step.
    out_ref[...] = out.astype(out_ref.dtype)


def _batch_tile(batch, max_tile=32):
    """Largest divisor of `batch` <= max_tile that still leaves >= 2 grid
    steps (keeps a parallel axis for v7x's 2 TensorCores)."""
    if batch <= 1:
        return 1
    for bt in range(min(batch // 2, max_tile), 0, -1):
        if batch % bt == 0:
            return bt
    return 1


def necto_forward(q, kv, m, params, batch_tile=None):
    B, NQ, DQ = q.shape
    _, NKV, DKV = kv.shape
    D = params["wq"].shape[1]
    DOUT = params["wo"].shape[1]

    bt = batch_tile if batch_tile is not None else _batch_tile(B)
    assert B % bt == 0, "batch tile must divide batch"
    nsteps = B // bt

    # Fold batch into matmul rows (free, contiguous reshapes in XLA).
    q2 = q.reshape(B * NQ, DQ)
    kv2 = kv.reshape(B * NKV, DKV)
    # Tiny [B, 1, NKV] additive mask bias, broadcast over queries in-kernel.
    mbias = jnp.where(m, -1e9, 0.0).astype(jnp.float32)[:, None, :]

    # One-time weight prep: fold the attention scale into wq/bq, cast all
    # projection / head weights to bf16 (the MXU operand dtype).  Biases stay
    # f32 since they are added to f32 accumulations.
    inv_sqrt_d = 1.0 / math.sqrt(D)
    wq = (params["wq"] * inv_sqrt_d).astype(jnp.bfloat16)
    bq = (params["bq"] * inv_sqrt_d).astype(jnp.float32)
    wk = params["wk"].astype(jnp.bfloat16)
    wv = params["wv"].astype(jnp.bfloat16)
    wo = params["wo"].astype(jnp.bfloat16)
    bk = params["bk"].astype(jnp.float32)
    bv = params["bv"].astype(jnp.float32)
    bo = params["bo"].astype(jnp.float32)

    shared2 = lambda shape: pl.BlockSpec(shape, lambda i: (0, 0))

    out2 = pl.pallas_call(
        necto_kernel,
        out_shape=jax.ShapeDtypeStruct((B * NQ, DOUT), jnp.float32),
        grid_spec=pltpu.PrefetchScalarGridSpec(
            num_scalar_prefetch=0,
            grid=(nsteps,),
            in_specs=[
                pl.BlockSpec((bt * NQ, DQ), lambda i: (i, 0)),     # q  (folded)
                pl.BlockSpec((bt * NKV, DKV), lambda i: (i, 0)),   # kv (folded)
                pl.BlockSpec((bt, 1, NKV), lambda i: (i, 0, 0)),   # mask bias
                shared2((DQ, D)),     # wq (bf16, pre-scaled)
                shared2((1, D)),      # bq
                shared2((DKV, D)),    # wk (bf16)
                shared2((1, D)),      # bk
                shared2((DKV, D)),    # wv (bf16)
                shared2((1, D)),      # bv
                shared2((D, DOUT)),   # wo (bf16)
                shared2((1, DOUT)),   # bo
            ],
            out_specs=pl.BlockSpec((bt * NQ, DOUT), lambda i: (i, 0)),
        ),
        compiler_params=pltpu.CompilerParams(
            dimension_semantics=("parallel",)),
    )(q2, kv2, mbias, wq, bq, wk, bk, wv, bv, wo, bo)

    return out2.reshape(B, NQ, DOUT)


def necto_reference(q, kv, m, params):
    """Pure-JAX f32 reference of the same forward pass (for validation)."""
    Q = jnp.einsum("bnd,dh->bnh", q, params["wq"]) + params["bq"]
    K = jnp.einsum("bnd,dh->bnh", kv, params["wk"]) + params["bk"]
    V = jnp.einsum("bnd,dh->bnh", kv, params["wv"]) + params["bv"]
    d = Q.shape[-1]
    s = jnp.einsum("bqh,bkh->bqk", Q, K) / math.sqrt(d)
    s = s + jnp.where(m, -1e9, 0.0)[:, None, :]
    p = jax.nn.softmax(s, axis=-1)
    attn = jnp.einsum("bqk,bkh->bqh", p, V)
    h = jnp.maximum(attn, 0.0)
    return jnp.einsum("bqh,ho->bqo", h, params["wo"]) + params["bo"]


if __name__ == "__main__":
    B, NQ, NKV = 2, 8, 16
    DQ, DKV, D, DOUT = 32, 32, 32, 16

    key = jax.random.PRNGKey(0)
    ks = jax.random.split(key, 10)

    q = jax.random.normal(ks[0], (B, NQ, DQ), dtype=jnp.float32)
    kv = jax.random.normal(ks[1], (B, NKV, DKV), dtype=jnp.float32)
    # Mask out the last few kv entities of batch 1, none of batch 0.
    m = jnp.zeros((B, NKV), dtype=bool).at[1, NKV - 4:].set(True)

    scale = lambda fan_in: 1.0 / math.sqrt(fan_in)
    params = {
        "wq": jax.random.normal(ks[2], (DQ, D), jnp.float32) * scale(DQ),
        "bq": jax.random.normal(ks[3], (1, D), jnp.float32) * 0.01,
        "wk": jax.random.normal(ks[4], (DKV, D), jnp.float32) * scale(DKV),
        "bk": jax.random.normal(ks[5], (1, D), jnp.float32) * 0.01,
        "wv": jax.random.normal(ks[6], (DKV, D), jnp.float32) * scale(DKV),
        "bv": jax.random.normal(ks[7], (1, D), jnp.float32) * 0.01,
        "wo": jax.random.normal(ks[8], (D, DOUT), jnp.float32) * scale(D),
        "bo": jax.random.normal(ks[9], (1, DOUT), jnp.float32) * 0.01,
    }

    ref = necto_reference(q, kv, m, params)

    # Default tiling: >= 2 grid steps so both v7x TensorCores stay busy.
    out = jax.block_until_ready(necto_forward(q, kv, m, params))
    assert out.shape == (B, NQ, DOUT)
    # bf16 MXU operands + approx reciprocal -> loosened tolerance vs f32 ref.
    assert jnp.allclose(out, ref, atol=1e-1, rtol=1e-1), \
        "mismatch vs reference (default tile)"

    # Fully batch-folded variant: single grid step, tallest projection matmuls.
    out_folded = jax.block_until_ready(
        necto_forward(q, kv, m, params, batch_tile=B))
    assert jnp.allclose(out_folded, ref, atol=1e-1, rtol=1e-1), \
        "mismatch vs reference (batch-folded)"

    print("KERNEL_OK")
</pallas_src>

<mosaic_0001>
module attributes {stable_mosaic.version = 11 : i64} {
  func.func @necto_kernel(%arg0: i32, %arg1: memref<8x32xf32, #tpu.memory_space<vmem>>, %arg2: memref<16x32xf32, #tpu.memory_space<vmem>>, %arg3: memref<1x1x16xf32, #tpu.memory_space<vmem>>, %arg4: memref<32x32xbf16, #tpu.memory_space<vmem>>, %arg5: memref<1x32xf32, #tpu.memory_space<vmem>>, %arg6: memref<32x32xbf16, #tpu.memory_space<vmem>>, %arg7: memref<1x32xf32, #tpu.memory_space<vmem>>, %arg8: memref<32x32xbf16, #tpu.memory_space<vmem>>, %arg9: memref<1x32xf32, #tpu.memory_space<vmem>>, %arg10: memref<32x16xbf16, #tpu.memory_space<vmem>>, %arg11: memref<1x16xf32, #tpu.memory_space<vmem>>, %arg12: memref<8x16xf32, #tpu.memory_space<vmem>>) attributes {dimension_semantics = [#tpu.dimension_semantics<parallel>], iteration_bounds = array<i64: 2>, scalar_prefetch = 0 : i64, scratch_operands = 0 : i64, tpu.core_type = #tpu.core_type<tc>, window_params = [{transform_indices = @transform_0, window_bounds = array<i64: 8, 32>}, {transform_indices = @transform_1, window_bounds = array<i64: 16, 32>}, {transform_indices = @transform_2, window_bounds = array<i64: 1, 1, 16>}, {pipeline_mode = #tpu.pipeline_mode<synchronous>, transform_indices = @transform_3, window_bounds = array<i64: 32, 32>}, {pipeline_mode = #tpu.pipeline_mode<synchronous>, transform_indices = @transform_4, window_bounds = array<i64: 1, 32>}, {pipeline_mode = #tpu.pipeline_mode<synchronous>, transform_indices = @transform_5, window_bounds = array<i64: 32, 32>}, {pipeline_mode = #tpu.pipeline_mode<synchronous>, transform_indices = @transform_6, window_bounds = array<i64: 1, 32>}, {pipeline_mode = #tpu.pipeline_mode<synchronous>, transform_indices = @transform_7, window_bounds = array<i64: 32, 32>}, {pipeline_mode = #tpu.pipeline_mode<synchronous>, transform_indices = @transform_8, window_bounds = array<i64: 1, 32>}, {pipeline_mode = #tpu.pipeline_mode<synchronous>, transform_indices = @transform_9, window_bounds = array<i64: 32, 16>}, {pipeline_mode = #tpu.pipeline_mode<synchronous>, transform_indices = @transform_10, window_bounds = array<i64: 1, 16>}, {transform_indices = @transform_11, window_bounds = array<i64: 8, 16>}]} {
    %c0 = arith.constant 0 : index
    %c0_0 = arith.constant 0 : index
    %0 = vector.load %arg1[%c0, %c0_0] : memref<8x32xf32, #tpu.memory_space<vmem>>, vector<8x32xf32>
    %1 = arith.truncf %0 : vector<8x32xf32> to vector<8x32xbf16>
    %c0_1 = arith.constant 0 : index
    %c0_2 = arith.constant 0 : index
    %2 = vector.load %arg2[%c0_1, %c0_2] : memref<16x32xf32, #tpu.memory_space<vmem>>, vector<16x32xf32>
    %3 = arith.truncf %2 : vector<16x32xf32> to vector<16x32xbf16>
    %c0_3 = arith.constant 0 : index
    %c0_4 = arith.constant 0 : index
    %4 = vector.load %arg4[%c0_3, %c0_4] : memref<32x32xbf16, #tpu.memory_space<vmem>>, vector<32x32xbf16>
    %cst = arith.constant dense<0.000000e+00> : vector<8x32xf32>
    %5 = tpu.matmul %1, %4, %cst {dimension_numbers = #tpu.dot_dimension_numbers<[1], [0], [0], [1], [0, 0, 1, 1], [], []>} : vector<8x32xbf16>, vector<32x32xbf16>, vector<8x32xf32> -> vector<8x32xf32>
    %c0_5 = arith.constant 0 : index
    %c0_6 = arith.constant 0 : index
    %6 = vector.load %arg5[%c0_5, %c0_6] : memref<1x32xf32, #tpu.memory_space<vmem>>, vector<1x32xf32>
    %7 = vector.broadcast %6 : vector<1x32xf32> to vector<8x32xf32>
    %8 = arith.addf %5, %7 : vector<8x32xf32>
    %c0_7 = arith.constant 0 : index
    %c0_8 = arith.constant 0 : index
    %9 = vector.load %arg6[%c0_7, %c0_8] : memref<32x32xbf16, #tpu.memory_space<vmem>>, vector<32x32xbf16>
    %cst_9 = arith.constant dense<0.000000e+00> : vector<16x32xf32>
    %10 = tpu.matmul %3, %9, %cst_9 {dimension_numbers = #tpu.dot_dimension_numbers<[1], [0], [0], [1], [0, 0, 1, 1], [], []>} : vector<16x32xbf16>, vector<32x32xbf16>, vector<16x32xf32> -> vector<16x32xf32>
    %c0_10 = arith.constant 0 : index
    %c0_11 = arith.constant 0 : index
    %11 = vector.load %arg7[%c0_10, %c0_11] : memref<1x32xf32, #tpu.memory_space<vmem>>, vector<1x32xf32>
    %12 = vector.broadcast %11 : vector<1x32xf32> to vector<16x32xf32>
    %13 = arith.addf %10, %12 : vector<16x32xf32>
    %c0_12 = arith.constant 0 : index
    %c0_13 = arith.constant 0 : index
    %14 = vector.load %arg8[%c0_12, %c0_13] : memref<32x32xbf16, #tpu.memory_space<vmem>>, vector<32x32xbf16>
    %cst_14 = arith.constant dense<0.000000e+00> : vector<16x32xf32>
    %15 = tpu.matmul %3, %14, %cst_14 {dimension_numbers = #tpu.dot_dimension_numbers<[1], [0], [0], [1], [0, 0, 1, 1], [], []>} : vector<16x32xbf16>, vector<32x32xbf16>, vector<16x32xf32> -> vector<16x32xf32>
    %c0_15 = arith.constant 0 : index
    %c0_16 = arith.constant 0 : index
    %16 = vector.load %arg9[%c0_15, %c0_16] : memref<1x32xf32, #tpu.memory_space<vmem>>, vector<1x32xf32>
    %17 = vector.broadcast %16 : vector<1x32xf32> to vector<16x32xf32>
    %18 = arith.addf %15, %17 : vector<16x32xf32>
    %19 = vector.shape_cast %8 : vector<8x32xf32> to vector<1x8x32xf32>
    %20 = arith.truncf %19 : vector<1x8x32xf32> to vector<1x8x32xbf16>
    %21 = vector.shape_cast %13 : vector<16x32xf32> to vector<1x16x32xf32>
    %22 = arith.truncf %21 : vector<1x16x32xf32> to vector<1x16x32xbf16>
    %23 = vector.shape_cast %18 : vector<16x32xf32> to vector<1x16x32xf32>
    %24 = arith.truncf %23 : vector<1x16x32xf32> to vector<1x16x32xbf16>
    "tpu.trace_start"() <{level = 10 : i32, message = "bqd,bkd->bqk"}> : () -> ()
    %cst_17 = arith.constant dense<0.000000e+00> : vector<1x8x16xf32>
    %25 = tpu.matmul %20, %22, %cst_17 {dimension_numbers = #tpu.dot_dimension_numbers<[2], [2], [1], [1], [0, 0, 0, 1, 1, 1], [0], [0]>} : vector<1x8x32xbf16>, vector<1x16x32xbf16>, vector<1x8x16xf32> -> vector<1x8x16xf32>
    "tpu.trace_stop"() : () -> ()
    %c0_18 = arith.constant 0 : index
    %c0_19 = arith.constant 0 : index
    %c0_20 = arith.constant 0 : index
    %26 = vector.load %arg3[%c0_18, %c0_19, %c0_20] : memref<1x1x16xf32, #tpu.memory_space<vmem>>, vector<1x1x16xf32>
    %27 = vector.broadcast %26 : vector<1x1x16xf32> to vector<1x8x16xf32>
    %28 = arith.addf %25, %27 : vector<1x8x16xf32>
    %cst_21 = arith.constant dense<0xFF800000> : vector<1x8xf32>
    %29 = vector.multi_reduction <maximumf>, %28, %cst_21 [2] : vector<1x8x16xf32> to vector<1x8xf32>
    %30 = vector.shape_cast %29 : vector<1x8xf32> to vector<1x8x1xf32>
    %31 = vector.broadcast %30 : vector<1x8x1xf32> to vector<1x8x16xf32>
    %32 = arith.subf %28, %31 : vector<1x8x16xf32>
    %33 = math.exp %32 : vector<1x8x16xf32>
    %cst_22 = arith.constant dense<0.000000e+00> : vector<1x8xf32>
    %34 = vector.multi_reduction <add>, %33, %cst_22 [2] : vector<1x8x16xf32> to vector<1x8xf32>
    %35 = vector.shape_cast %34 : vector<1x8xf32> to vector<1x8x1xf32>
    %36 = tpu.reciprocal %35 {approx = true} : vector<1x8x1xf32> -> vector<1x8x1xf32>
    %37 = vector.broadcast %36 : vector<1x8x1xf32> to vector<1x8x16xf32>
    %38 = arith.mulf %33, %37 : vector<1x8x16xf32>
    %39 = arith.truncf %38 : vector<1x8x16xf32> to vector<1x8x16xbf16>
    "tpu.trace_start"() <{level = 10 : i32, message = "bqk,bkd->bqd"}> : () -> ()
    %cst_23 = arith.constant dense<0.000000e+00> : vector<1x8x32xf32>
    %40 = tpu.matmul %39, %24, %cst_23 {dimension_numbers = #tpu.dot_dimension_numbers<[2], [1], [1], [2], [0, 0, 0, 1, 1, 2], [0], [0]>} : vector<1x8x16xbf16>, vector<1x16x32xbf16>, vector<1x8x32xf32> -> vector<1x8x32xf32>
    "tpu.trace_stop"() : () -> ()
    %cst_24 = arith.constant 0.000000e+00 : f32
    %41 = vector.broadcast %cst_24 : f32 to vector<1x8x32xf32>
    %42 = arith.maximumf %40, %41 : vector<1x8x32xf32>
    %43 = vector.shape_cast %42 : vector<1x8x32xf32> to vector<8x32xf32>
    %44 = arith.truncf %43 : vector<8x32xf32> to vector<8x32xbf16>
    %c0_25 = arith.constant 0 : index
    %c0_26 = arith.constant 0 : index
    %45 = vector.load %arg10[%c0_25, %c0_26] : memref<32x16xbf16, #tpu.memory_space<vmem>>, vector<32x16xbf16>
    %cst_27 = arith.constant dense<0.000000e+00> : vector<8x16xf32>
    %46 = tpu.matmul %44, %45, %cst_27 {dimension_numbers = #tpu.dot_dimension_numbers<[1], [0], [0], [1], [0, 0, 1, 1], [], []>} : vector<8x32xbf16>, vector<32x16xbf16>, vector<8x16xf32> -> vector<8x16xf32>
    %c0_28 = arith.constant 0 : index
    %c0_29 = arith.constant 0 : index
    %47 = vector.load %arg11[%c0_28, %c0_29] : memref<1x16xf32, #tpu.memory_space<vmem>>, vector<1x16xf32>
    %48 = vector.broadcast %47 : vector<1x16xf32> to vector<8x16xf32>
    %49 = arith.addf %46, %48 : vector<8x16xf32>
    %c0_30 = arith.constant 0 : index
    %c0_31 = arith.constant 0 : index
    %50 = vector.load %arg12[%c0_30, %c0_31] : memref<8x16xf32, #tpu.memory_space<vmem>>, vector<8x16xf32>
    tpu.vector_store %arg12[%c0_30, %c0_31], %49 {strides = array<i32>} : memref<8x16xf32, #tpu.memory_space<vmem>>, vector<8x16xf32>,
    return
  }
  func.func @transform_0(%arg0: i32) -> (i32, i32) {
    %c0_i32 = arith.constant 0 : i32
    %c0_i32_0 = arith.constant 0 : i32
    return %arg0, %c0_i32 : i32, i32
  }
  func.func @transform_1(%arg0: i32) -> (i32, i32) {
    %c0_i32 = arith.constant 0 : i32
    %c0_i32_0 = arith.constant 0 : i32
    return %arg0, %c0_i32 : i32, i32
  }
  func.func @transform_2(%arg0: i32) -> (i32, i32, i32) {
    %c0_i32 = arith.constant 0 : i32
    %c0_i32_0 = arith.constant 0 : i32
    %c0_i32_1 = arith.constant 0 : i32
    return %arg0, %c0_i32, %c0_i32_0 : i32, i32, i32
  }
  func.func @transform_3(%arg0: i32) -> (i32, i32) {
    %c0_i32 = arith.constant 0 : i32
    %c0_i32_0 = arith.constant 0 : i32
    %c0_i32_1 = arith.constant 0 : i32
    return %c0_i32, %c0_i32_0 : i32, i32
  }
  func.func @transform_4(%arg0: i32) -> (i32, i32) {
    %c0_i32 = arith.constant 0 : i32
    %c0_i32_0 = arith.constant 0 : i32
    %c0_i32_1 = arith.constant 0 : i32
    return %c0_i32, %c0_i32_0 : i32, i32
  }
  func.func @transform_5(%arg0: i32) -> (i32, i32) {
    %c0_i32 = arith.constant 0 : i32
    %c0_i32_0 = arith.constant 0 : i32
    %c0_i32_1 = arith.constant 0 : i32
    return %c0_i32, %c0_i32_0 : i32, i32
  }
  func.func @transform_6(%arg0: i32) -> (i32, i32) {
    %c0_i32 = arith.constant 0 : i32
    %c0_i32_0 = arith.constant 0 : i32
    %c0_i32_1 = arith.constant 0 : i32
    return %c0_i32, %c0_i32_0 : i32, i32
  }
  func.func @transform_7(%arg0: i32) -> (i32, i32) {
    %c0_i32 = arith.constant 0 : i32
    %c0_i32_0 = arith.constant 0 : i32
    %c0_i32_1 = arith.constant 0 : i32
    return %c0_i32, %c0_i32_0 : i32, i32
  }
  func.func @transform_8(%arg0: i32) -> (i32, i32) {
    %c0_i32 = arith.constant 0 : i32
    %c0_i32_0 = arith.constant 0 : i32
    %c0_i32_1 = arith.constant 0 : i32
    return %c0_i32, %c0_i32_0 : i32, i32
  }
  func.func @transform_9(%arg0: i32) -> (i32, i32) {
    %c0_i32 = arith.constant 0 : i32
    %c0_i32_0 = arith.constant 0 : i32
    %c0_i32_1 = arith.constant 0 : i32
    return %c0_i32, %c0_i32_0 : i32, i32
  }
  func.func @transform_10(%arg0: i32) -> (i32, i32) {
    %c0_i32 = arith.constant 0 : i32
    %c0_i32_0 = arith.constant 0 : i32
    %c0_i32_1 = arith.constant 0 : i32
    return %c0_i32, %c0_i32_0 : i32, i32
  }
  func.func @transform_11(%arg0: i32) -> (i32, i32) {
    %c0_i32 = arith.constant 0 : i32
    %c0_i32_0 = arith.constant 0 : i32
    return %arg0, %c0_i32 : i32, i32
  }
}

</mosaic_0001>

<bundles_post_ra>
// kernel: tpu_custom_call.1
= control target key start
LH: loop header
LB: loop body
LE: loop exit
PB: predicated region body
PF: predicated region fallthrough
CT: control target
= control target key end

     0   :  { %s1467_s0 = inlined_call_operand.vmem [shape: f32[16,32], index: 0, kind: input, shape index: {}]   ;;  %s1468_s1 = inlined_call_operand.hbm [shape: f32[32,32], index: 1, kind: input, shape index: {}]   ;;  %s1469_s2 = inlined_call_operand.vmem [shape: f32[2,1,16], index: 2, kind: input, shape index: {}]   ;;  %s1470_s3 = inlined_call_operand.hbm [shape: bf16[32,32], index: 3, kind: input, shape index: {}]   ;;  %s1471_s4 = inlined_call_operand.vmem [shape: f32[1,32], index: 4, kind: input, shape index: {}]   ;;  %s1472_s5 = inlined_call_operand.hbm [shape: bf16[32,32], index: 5, kind: input, shape index: {}]   ;;  %s1473_s6 = inlined_call_operand.vmem [shape: f32[1,32], index: 6, kind: input, shape index: {}]   ;;  %s1474_s7 = inlined_call_operand.hbm [shape: bf16[32,32], index: 7, kind: input, shape index: {}]   ;;  %s1475_s8 = inlined_call_operand.vmem [shape: f32[1,32], index: 8, kind: input, shape index: {}]   ;;  %s1476_s9 = inlined_call_operand.vmem [shape: bf16[32,16], index: 9, kind: input, shape index: {}]   ;;  %s1477_s10 = inlined_call_operand.vmem [shape: f32[1,16], index: 10, kind: input, shape index: {}]   ;;  %s1478_s11 = inlined_call_operand.hbm [shape: f32[16,16], index: 11, kind: output, shape index: {}]  }
   0x1   :  { %1480 = sst [smem:[#allocation17_spill]] %s1470_s3 }
   0x2   :  { %1481 = sst [smem:[#allocation18_spill]] %s1472_s5 }
   0x3   :  { %1482 = sst [smem:[#allocation19_spill]] %s1474_s7 }
   0x4   :  { %16 = vsyncpa [#allocation3], 0 }
   0x5   :  { %18 = vsyncpa [#allocation3 + $0x1], 0 }
   0x6   :  { %19 = vsyncpa [#allocation6], 0 }
   0x7   :  { %20 = vsyncpa [#allocation9], 0 }
   0x8   :  { %21 = vsyncpa [#allocation4], 0 }
   0x9   :  { %23 = vsyncpa [#allocation4 + $0x1], 0  ;;  %s1266_s17 = smov 0   ;;  %s1268_s18 = smov 0  }
   0xa   :  { %s1270_s19 = smov 0   ;;  %s1272_s20 = smov 0  }
   0xb LB: > { %1483 = sst [smem:[#allocation15_spill]] %s1193_s19  ;;  %s1287_s21 = sadd.s32 4294967295, %s1197_s20   ;;  %s1197_s20 = sphi %s1272_s20, %s1499_s20   ;;  %s1193_s19 = sphi %s1270_s19, %s1496_s19   ;;  %s1189_s18 = sphi %s1268_s18, %s1498_s18   ;;  %s1185_s17 = sphi %s1266_s17, %s1497_s17  }
   0xc   : > { %s846_s22 = sadd.s32 4294967294, %s1197_s20   ;;  %p75_p0 = scmp.ne.s32.totalorder %s1189_s18, %s1185_s17 }
   0xd   : > { %p76_p1 = scmp.eq.s32.totalorder %s1287_s21, 0  ;;  %p293_p2 = scmp.eq.s32.totalorder %s1287_s21, 1 }
   0xe   : > { %p299_p3 = scmp.eq.s32.totalorder %s846_s22, 1  ;;  %p847_p5 = scmp.ge.s32.totalorder %s1197_s20, 1 }
   0xf   : > { %p1296_p4 = por %p76_p1, %p75_p0  ;;  %p306_p7 = scmp.lt.s32.totalorder %s1197_s20, 3 }
  0x10   : > { %p1301_p6 = por %p299_p3, %p75_p0  ;;  %s1486_s3 = sld [smem:[#allocation17_spill]] }
  0x11   : > { %p1309_p8 = pnand %p847_p5, %p306_p7  ;;  %s1199_s29 = smov [#allocation5]  }
  0x12   : > { %s319_s30 = sshll.u32 %s1199_s29, 4  ;;  %s1489_s5 = sld [smem:[#allocation18_spill]]  ;;  %s320_s30 = int_to_ptr.vmem [resolvable:$true] %s319_s30 }
  0x13   : > { %p929_p9 = pneg %p1309_p8  ;;  %s1200_s16 = smov 64  }
  0x14   : > { %s1201_s22 = smov 4   ;;  %s1202_s25 = smov [#allocation7]  }
  0x15   : > { %p1317_p10 = pnand %p929_p9, %p76_p1  ;;  %s336_s26 = sshll.u32 %s1202_s25, 4  ;;  %s337_s26 = int_to_ptr.vmem [resolvable:$true] %s336_s26 }
  0x16   : > { %s317_s27 = sshll.u32 %s1486_s3, 4  ;;  %s1490_s7 = sld [smem:[#allocation19_spill]]  ;;  %s318_s27 = int_to_ptr.hbm [resolvable:$true] %s317_s27 }
  0x17   : > { %932 = dma.hbm_to_vmem [thread:$0]  (!%p1317_p10), %s318_s27, 256, %s320_s30, [#allocation6], %s1200_s16, %s1200_s16, %s1201_s22  }
  0x18   : > { %s334_s15 = sshll.u32 %s1489_s5, 4  ;;  %s1203_s14 = smov [#allocation8]   ;;  %s335_s15 = int_to_ptr.hbm [resolvable:$true] %s334_s15 }
  0x19   : > { %935 = dma.hbm_to_vmem [thread:$0]  (!%p1317_p10), %s335_s15, 256, %s337_s26, [#allocation6], %s1200_s16, %s1200_s16, %s1201_s22  }
  0x1a   : > { %s353_s5 = sshll.u32 %s1203_s14, 4  ;;  %s1333_s27 = sadd.s32 1, %s1197_s20   ;;  %s354_s5 = int_to_ptr.vmem [resolvable:$true] %s353_s5 }
  0x1b   : > { %s59_s30 = ssub.s32 %s1197_s20, %s1333_s27  ;;  %s62_s25 = sadd.s32 1, %s1193_s19 }
  0x1c   : > { %s351_s13 = sshll.u32 %s1490_s7, 4  ;;  %p60_p12 = scmp.eq.s32.totalorder %s59_s30, 0  ;;  %s352_s13 = int_to_ptr.hbm [resolvable:$true] %s351_s13 }
  0x1d   : > { %938 = dma.hbm_to_vmem [thread:$0]  (!%p1317_p10), %s352_s13, 256, %s354_s5, [#allocation9], %s1200_s16, %s1200_s16, %s1201_s22  }
  0x1e   : > { %p69_p13 = scmp.ne.s32.totalorder %s1193_s19, %s1189_s18  ;;  %p70_p0 = scmp.eq.s32.totalorder %s1197_s20, 0 }
  0x1f   : > { %p950_p3 = scmp.lt.s32.totalorder %s1197_s20, 2  ;;  %s383_s26 = sand.u32 1, %s1193_s19  }
  0x20   : > { %s1345_s3 = scalar_select %p60_p12, %s1193_s19, %s62_s25  }
  0x21   : > { %p71_p5 = por %p70_p0, %p69_p13  ;;  %p1349_p7 = por %p293_p2, %p69_p13 }
  0x22   : > { %1491 = sst [smem:[#allocation16_spill]] %s1345_s3  ;;  %s904_s29 = sshll.u32 %s1197_s20, 4 }
  0x23   : > { %s852_s12 = sshll.u32 %s383_s26, 4  ;;  %s392_s16 = scalar_lea.hbm %s1468_s1, %s904_s29 }
  0x24   : > { %s393_s22 = sshll.u32 %s392_s16, 4  ;;  %s387_s13 = scalar_lea.vmem [#allocation2], %s852_s12  ;;  %s394_s22 = int_to_ptr.hbm [resolvable:$true] %s393_s22 }
  0x25   : > { %s395_s30 = sshll.u32 %s387_s13, 4  ;;  %p1360_p9 = pnand %p950_p3, %p71_p5  ;;  %s396_s30 = int_to_ptr.vmem [resolvable:$true] %s395_s30 }
  0x26   : > { %s384_s7 = scalar_lea.sflag [#allocation3], %s383_s26  ;;  %s1093_s3 = sshra.s32 %s394_s22, 4  ;;  %s1094_s3 = int_to_ptr.hbm [resolvable:$true] %s1093_s3 }
  0x27   : > { %s1095_s19 = scalar_lea.hbm %s1094_s3, 16  ;;  %p1097_p10 = pneg %p1360_p9 }
  0x28   : > { %p1096_p2 = scmp.ne.s32.totalorder %s1094_s3, %s1095_s19  ;;  %s1100_s14 = scalar_lea.hbm %s1468_s1, 32 }
  0x29   : > { %p1101_p0 = scmp.lt.s32.totalorder %s1094_s3, %s1468_s1  ;;  %p1102_p3 = scmp.lt.s32.totalorder %s1100_s14, %s1095_s19 }
  0x2a   : > { %p1098_p12 = pnand %p1097_p10, %p1096_p2 }
  0x2b   : > { %p1103_p5 = por %p1102_p3, %p1101_p0 }
  0x2c   : > { %p1099_p13 = pneg %p1098_p12 }
  0x2e   : > { %p1104_p11 = pnand %p1103_p5, %p1099_p13 }
  0x30   : > { %1107 = shalt.err (!%p1104_p11)
}
  0x31   : > { %s1204_s26 = smov 128   ;;  %s1205_s13 = smov 8  }
  0x32   : > { %942 = dma.hbm_to_vmem [thread:$0]  (!%p1360_p9), %s394_s22, 256, %s396_s30, %s384_s7, %s1204_s26, %s1204_s26, %s1205_s13  }
  0x33   : > { %413 = sbr.rel (%p1309_p8) target bundleno = 873 (0x369), region = 64  ;;  %s1377_s29 = sand.u32 (!%p1309_p8), 1, %s1189_s18  }
  0x34   : > { %s856_s12 = sshll.u32 (!%p1309_p8), %s1377_s29, 4  ;;  %s416_s3 = scalar_lea.sflag (!%p1309_p8), [#allocation3], %s1377_s29 }
  0x35   : > { %s419_s19 = scalar_lea.vmem (!%p1309_p8), [#allocation2], %s856_s12 }
  0x38   : > { %1168 = dma.done.wait (%p1296_p4), %s416_s3, 256  }
  0x39   : > { %1170 = vsyncadd (%p1296_p4), %s416_s3, 4294967040 }
  0x3a   : > { %1172 = dma.done.wait (%p76_p1), [#allocation6], 512  }
  0x3b   : > { %1174 = vsyncadd (%p76_p1), [#allocation6], 4294966784 }
  0x3c   : > { %1176 = dma.done.wait (%p76_p1), [#allocation9], 256  }
  0x3d   : > { %1178 = vsyncadd (%p76_p1), [#allocation9], 4294967040  ;;  %p481_p8 = scmp.lt.s32.totalorder %s1287_s21, 1  ;;  %v908_v0 = vld [vmem:[#allocation7 + $0x8] sm:$0xff]  ;;  %v907_v1 = vld [vmem:[#allocation7] sm:$0xff]  ;;  %vm515_vm0 = vcmask 261120  }
  0x3e   : > { %v492_v2 = vld [vmem:[%s419_s19] sm:$0xff]  ;;  %v493_v3 = vld [vmem:[%s419_s19 + $0x8] sm:$0xff]  ;;  %561 = vmatpush.bf16.msra.mxu1 %v908_v0  ;;  %vm636_vm1 = vcmask 130048   ;;  %s860_s25 = sshll.u32 %s1377_s29, 3 }
  0x3f   : > { %s1395_s7 = scalar_select %p481_p8, %s1287_s21, 1  ;;  %v906_v4 = vld [vmem:[#allocation5 + $0x8] sm:$0xff]  ;;  %v905_v5 = vld [vmem:[#allocation5] sm:$0xff]  ;;  %v494_v7 = vpack.c.bf16 %v493_v3, %v492_v2 }
  0x40   : > { %525 = vmatpush.bf16.msra.mxu0 %v906_v4  ;;  %v994_v10 = vld [vmem:[%s1473_s6] ss:$0 sm:$0xff]  ;;  %v910_v25 = vld [vmem:[#allocation8 + $0x8] sm:$0xff]  ;;  %s480_s12 = scalar_lea.vmem [#allocation10], %s860_s25 }
  0x41   : > { %s861_s23 = sshll.u32 %s1395_s7, 3  ;;  %s488_s5 = scalar_lea.vmem %s1469_s2, %s1395_s7  ;;  %v995_v20 = vld [vmem:[%s1471_s4] ss:$0 sm:$0xff]  ;;  %595 = vmatpush.bf16.msra.mxu2 %v910_v25  ;;  %v912_v47 = vld [vmem:[%s1476_s9 + $0x8] sm:$0xff] }
  0x42   : > { %s484_s30 = scalar_lea.vmem %s1467_s0, %s861_s23  ;;  %562 = vmatpush.bf16.msra.mxu1 %v907_v1  ;;  %v909_v26 = vld [vmem:[#allocation8] sm:$0xff]  ;;  %s723_s3 = sshll.u32 %s480_s12, 4  ;;  %s724_s3 = int_to_ptr.vmem [resolvable:$true] %s723_s3 }
  0x43   : > { %v490_v6 = vld [vmem:[%s484_s30] sm:$0xff]  ;;  %s901_s30 = sshll.u32 %s1287_s21, 3  ;;  %s711_s21 = scalar_lea.sflag [#allocation4], %s1377_s29 }
  0x44   : > { %v491_v8 = vpack.c.bf16 %v490_v6, %v490_v6  ;;  %526 = vmatpush.bf16.msra.mxu0 %v905_v5  ;;  %v996_v27 = vld [vmem:[%s488_s5] ss:$0 sm:$0xff]  ;;  %s721_s16 = scalar_lea.hbm %s1478_s11, %s901_s30  ;;  %s1143_s30 = scalar_lea.hbm %s1478_s11, 16 }
  0x45   : > { %879 = vmatmul.msk.bf16.vlgmr.msra.gmra.mxu1 %vm515_vm0, %v494_v7  ;;  %596 = vmatpush.bf16.msra.mxu2 %v909_v26  ;;  %v997_v32 = vld [vmem:[%s1475_s8] ss:$0 sm:$0xff]  ;;  %s725_s19 = sshll.u32 %s721_s16, 4  ;;  %s726_s19 = int_to_ptr.hbm [resolvable:$true] %s725_s19 }
  0x46   : > { %702 = vmatpush.bf16.msrb.mxu1 %v912_v47  ;;  %v911_v48 = vld [vmem:[%s1476_s9] sm:$0xff]  ;;  %s1137_s7 = sshra.s32 %s726_s19, 4  ;;  %s1138_s7 = int_to_ptr.hbm [resolvable:$true] %s1137_s7 }
  0x47   : > { %870 = vmatmul.msk.bf16.vlgmr.msra.gmra.mxu0 %vm515_vm0, %v491_v8  ;;  %v998_v57 = vld [vmem:[%s1477_s10] ss:$0 sm:$0xff]  ;;  %s1139_s23 = scalar_lea.hbm %s1138_s7, 8  ;;  %p1144_p9 = scmp.lt.s32.totalorder %s1138_s7, %s1478_s11 }
  0x48   : > { %888 = vmatmul.msk.bf16.vlgmr.msra.gmra.mxu2 %vm515_vm0, %v494_v7  ;;  %p1140_p1 = scmp.ne.s32.totalorder %s1138_s7, %s1139_s23  ;;  %p1145_p2 = scmp.lt.s32.totalorder %s1143_s30, %s1139_s23 }
  0x4a   : > { %703 = vmatpush.bf16.msrb.mxu1 %v911_v48  ;;  %p1141_p4 = pnand %p1140_p1, %p1349_p7  ;;  %p1146_p10 = por %p1145_p2, %p1144_p9 }
  0x4c   : > { %p1142_p11 = pneg %p1141_p4 }
  0x4e   : > { %p1147_p12 = pnand %p1146_p10, %p1142_p11 }
  0xc2   : > { %v564_v9 = vpop.f32.mrf.mxu1 }
  0xc3   : > { %v565_v12 = vadd.f32 %v994_v10, %v564_v9 }
  0xc4   : > { %v528_v11 = vpop.f32.mrf.mxu0 }
  0xc5   : > { %v604_v14 = vpack.c.bf16 %v565_v12, %v565_v12  ;;  %v529_v22 = vadd.f32 %v995_v20, %v528_v11 }
  0xc7   : > { %v614_v18 = vunpack.c.l.b16 %v604_v14  ;;  %v603_v24 = vpack.c.bf16 %v529_v22, %v529_v22 }
  0xca   : > { %v566_v13 = vpop.f32.mrf.mxu1 }
  0xcb   : > { %v567_v15 = vadd.f32 %v994_v10, %v566_v13  ;;  %v598_v33 = vpop.f32.mrf.mxu2 }
  0xcc   : > { %v530_v16 = vpop.f32.mrf.mxu0  ;;  %v599_v35 = vadd.f32 %v997_v32, %v598_v33 }
  0xcd   : > { %v605_v17 = vpack.c.bf16 %v567_v15, %v567_v15 }
  0xce   : > { %v606_v38 = vpack.c.bf16 %v599_v35, %v599_v35 }
  0xcf   : > { %v615_v19 = vunpack.c.l.b16 %v605_v17 }
  0xd0   : > { %v651_v41 = vunpack.c.l.b16 %v606_v38 }
  0xd1   : > { %v616_v21 = vpack.c.b16 %v615_v19, %v614_v18 }
  0xd3   : > { %v621_v23 = vsel %vm515_vm0, %v616_v21, 0  ;;  %v600_v39 = vpop.f32.mrf.mxu2 }
  0xd4   : > { %630 = vmatpush.bf16.xpose.msra.mxu3 %v621_v23  ;;  %v601_v40 = vadd.f32 %v997_v32, %v600_v39 }
  0xd6   : > { %v607_v42 = vpack.c.bf16 %v601_v40, %v601_v40 }
  0xd8   : > { %v652_v43 = vunpack.c.l.b16 %v607_v42 }
  0xda   : > { %v653_v46 = vpack.c.b16 %v652_v43, %v651_v41 }
  0xdb   : > { %889 = vmatmul.msk.bf16.vlgmr.msra.gmra.mxu3 %vm515_vm0, %v603_v24 }
  0xdc   : > { %665 = vmatpush.bf16.msrb.mxu0 %v653_v46 }
 0x15e   : > { %v632_v28 = vpop.f32.mrf.mxu3 }
 0x15f   : > { %v633_v29 = vadd.f32 %v996_v27, %v632_v28 }
 0x161   : > { %v637_v30 = vsel %vm636_vm1, %v633_v29, -inf }
 0x162   : > { %638 = vmax.xlane.f32.xlu0 %v637_v30 }
 0x166   : > { %v634_v31 = vpop.f32.mrf.mxu3 }
 0x1d5   : > { %v639_v34 = vpop.xlane.xlu0 %638 }
 0x1d6   : > { %v640_v36 = vsub.f32 %v633_v29, %v639_v34 }
 0x1d8   : > { %v641_v37 = vmul.f32 1.442695, %v640_v36 }
 0x1da   : > { %999 = vpow2.f32 %v641_v37 }
 0x1e0   : > { %v1000_v44 = vpop.eup %999 }
 0x1e1   : > { %v643_v45 = vsel %vm636_vm1, %v1000_v44, 0.0 }
 0x1e2   : > { %644 = vadd.xlane.f32.xlu0 %v643_v45 }
 0x255   : > { %v645_v49 = vpop.xlane.xlu0 %644 }
 0x256   : > { %1001 = vrcp.f32 %v645_v49 }
 0x25c   : > { %v1002_v50 = vpop.eup %1001 }
 0x25d   : > { %v647_v51 = vmul.f32 %v1002_v50, %v1000_v44 }
 0x25f   : > { %v648_v52 = vpack.c.bf16 %v647_v51, %v647_v51 }
 0x261   : > { %890 = vmatmul.msk.bf16.vlgmr.msrb.gmra.mxu0 %vm636_vm1, %v648_v52 }
 0x2de   : > { %v667_v53 = vpop.f32.mrf.mxu0 }
 0x2df   : > { %v671_v54 = vmax.f32 %v667_v53, 0.0 }
 0x2e1   : > { %v672_v55 = vpack.c.bf16 %v671_v54, %v671_v54 }
 0x2e3   : > { %899 = vmatmul.msk.bf16.vlgmr.msrb.gmra.mxu1 %vm515_vm0, %v672_v55 }
 0x2e6   : > { %v669_v56 = vpop.f32.mrf.mxu0 }
 0x360   : > { %v705_v58 = vpop.f32.mrf.mxu1 }
 0x361   : > { %v706_v59 = vadd.f32 %v998_v57, %v705_v58 }
 0x363   : > { %709 = vst.msk [vmem:[%s480_s12] sm:$0xff] %vm636_vm1, %v706_v59 }
 0x364   : > { %1150 = shalt.err (!%p1147_p12)
}
 0x365   : > { %927 = dma.vmem_to_hbm [thread:$0]  (%p1349_p7), %s724_s3, 128, %s726_s19, %s711_s21  }
 0x368   : > { %v707_v60 = vpop.f32.mrf.mxu1 }
 0x369 PF: > { %s737_s29 = sand.u32 1, %s1185_s17   ;;  %p1494_p13 = scmp.ge.s32.totalorder %s1197_s20, 2 }
 0x36a   : > { %s738_s5 = scalar_lea.sflag [#allocation4], %s737_s29 }
 0x36b   : > { %p944_p0 = pnand %p1494_p13, %p1301_p6 }
 0x36d   : > { %p945_p3 = pneg %p944_p0 }
 0x36f   : > { %1180 = dma.done.wait (%p945_p3), %s738_s5, 128  }
 0x370   : > { %1182 = vsyncadd (%p945_p3), %s738_s5, 4294967168  ;;  %s1495_s16 = sld [smem:[#allocation15_spill]]  ;;  %p26_p5 = scmp.ge.s32.totalorder %s1333_s27, 4  }
 0x371   : > { %s1496_s19 = sld [smem:[#allocation16_spill]]  ;;  %s1497_s17 = smov %s1189_s18 }
 0x372   : > { %s1499_s20 = smov %s1333_s27  ;;  %28 = sbr.rel (!%p26_p5) target bundleno = 11 (0xb), region = 127 }
 0x376   : > { %s1498_s18 = smov %s1495_s16 }
 0x377   :  { %744 = vsyncpa [#allocation3], 1 }
 0x378   :  { %746 = vsyncpa [#allocation3 + $0x1], 1 }
 0x379   :  { %747 = vsyncpa [#allocation6], 1 }
 0x37a   :  { %748 = vsyncpa [#allocation9], 1 }
 0x37b   :  { %749 = vsyncpa [#allocation4], 1 }
 0x37c   :  { %751 = vsyncpa [#allocation4 + $0x1], 1 }

</bundles_post_ra>
